<compile_context>
chip_gen: v5e
topology: v5e:2x2
jax: 0.10.0
libtpu: 0.0.40
codegen_flags: <defaults>
</compile_context>

<pallas_src>
import functools

import jax
import jax.numpy as jnp
from jax.experimental import pallas as pl
from jax.experimental.pallas import tpu as pltpu

_SUB, _LANE = 8, 128


def _round_up(x, m):
    return -(-x // m) * m


def _rel_pos_kernel(table_ref, out_ref, win_ref, *, max_len, seq_len, pad_front,
                    aligned):
    """table_ref: (rows_total, d_model) front/back padded table (VMEM-resident).
    out_ref:   (block_i, block_j, d_model) output tile.
    win_ref:   (block_i + block_j - 1, d_model) VMEM scratch window.
    """
    block_i, block_j, _ = out_ref.shape
    win_rows = block_i + block_j - 1
    i0 = pl.program_id(0) * block_i          # first output (query) row of tile
    j0 = pl.program_id(1) * block_j          # first output (key) column of tile

    # Output row gi, column j reads padded-table row pad_front + max_len-1-gi + j.
    # The smallest row needed by this tile (gi = i0 + block_i - 1, j = j0):
    win_start = (pad_front + max_len - block_i) - i0 + j0
    if aligned:
        # pad_front / block sizes were chosen so this divisibility really holds.
        win_start = pl.multiple_of(win_start, _SUB)

    if block_i == 1:
        # The window *is* the single output row; skip the staging copy.
        out_ref[0] = table_ref[pl.ds(win_start, block_j), :]
        return

    # One dynamic-offset slice per grid step; every per-row copy below uses a
    # static offset into this window (cheap addressing, LLO-schedulable).
    win_ref[...] = table_ref[pl.ds(win_start, win_rows), :]

    def copy_row(r):
        s = block_i - 1 - r                  # static Python int offset
        out_ref[r] = win_ref[s:s + block_j, :]

    rem = seq_len % block_i                  # valid rows in a ragged last i-block
    for r in range(block_i):                 # static loop, bounded by _plan()
        if rem and r >= rem:
            # Only these rows can fall off the end (in the last i-block);
            # skip their copy entirely instead of clamping and copying anyway.
            @pl.when(i0 + r < seq_len)
            def _(r=r):
                copy_row(r)
        else:
            copy_row(r)


def _plan(seq_len, d_model, max_len, itemsize):
    """Pick (block_i, block_j) and an explicit VMEM limit, generation-aware."""
    dpad = _round_up(d_model, _LANE)         # lane-padded width of one row
    unit = dpad * itemsize                   # bytes of one padded row

    try:                                     # 128 MiB on v5e/v6e, 64 MiB on v7x
        phys = int(pltpu.get_tpu_info().vmem_capacity_bytes)
    except Exception:
        phys = 64 * 1024 * 1024              # conservative default (v7x-class)
    budget = int(phys * 0.40)                # target working-set size
    vmem_limit = int(phys * 0.75)            # explicit scoped-VMEM limit

    vocab = 2 * max_len - 1
    # The whole (padded) table stays resident and is double-buffered by Pallas.
    table_est = _round_up(vocab + 512, _SUB) * unit
    avail = max(budget - 2 * table_est, 3 * _SUB * unit)

    # --- j (key) axis: split only when one full output row can't fit ---------
    if 3 * _round_up(seq_len, _SUB) * unit <= avail:
        block_j = seq_len
    else:
        block_j = max(_SUB, (avail // (3 * unit)) // _SUB * _SUB)
        block_j = min(block_j, seq_len)
    n_j = -(-seq_len // block_j)

    # --- i (query) axis -------------------------------------------------------
    per_i = 2 * _round_up(block_j, _SUB) * unit + unit   # 2x out rows + window row
    fixed = block_j * unit                               # window tail
    bi_budget = max(1, (avail - fixed) // per_i)
    bi_cap = 256                                         # bound the unrolled loop
    min_steps_i = -(-4 // n_j)                           # >= ~4 total grid steps
    bi_steps = -(-seq_len // min_steps_i)
    block_i = int(max(1, min(seq_len, bi_budget, bi_cap, bi_steps)))
    n_i = -(-seq_len // block_i)
    return block_i, int(block_j), n_i, n_j, vmem_limit


def relative_positional_embedding(x, table, max_len):
    """x: (batch, seq_len) int array (only the shape is used);
    table: (2*max_len-1, d_model).  Returns (seq_len, seq_len, d_model)."""
    _, seq_len = x.shape
    vocab, d_model = table.shape
    if vocab != 2 * max_len - 1:
        raise ValueError("embedding table must have 2*max_len-1 rows")
    if seq_len > max_len:
        # nn.Embedding would raise an index error; fail loudly instead of
        # silently reading out of bounds.
        raise ValueError(f"seq_len ({seq_len}) must be <= max_len ({max_len})")

    itemsize = jnp.dtype(table.dtype).itemsize
    block_i, block_j, n_i, n_j, vmem_limit = _plan(seq_len, d_model, max_len,
                                                   itemsize)

    # Front-pad the table so the ragged last i-block's window never starts
    # below row 0 (keeps every per-row offset static).  When block_i is a
    # multiple of 8, also pick the pad so every window start is 8-aligned and
    # the pl.multiple_of hint in the kernel is valid.
    pad_front = block_i - 1
    aligned = (block_i % _SUB == 0)
    if aligned:
        pad_front += (-(pad_front + max_len - block_i)) % _SUB
    # Back-pad so a ragged last j-block's window never runs past the table.
    pad_end = max(0, n_j * block_j - max_len)
    tbl = table
    if pad_front or pad_end:
        tbl = jnp.pad(table, ((pad_front, pad_end), (0, 0)))
    rows_total = vocab + pad_front + pad_end

    # Residency check: 2x resident table + 2x out tile + window scratch.
    unit = _round_up(d_model, _LANE) * itemsize
    need = (2 * _round_up(rows_total, _SUB) * unit
            + 2 * block_i * _round_up(block_j, _SUB) * unit
            + (block_i + block_j) * unit)
    if need > vmem_limit:
        # TODO(synk): for huge tables switch the table input to
        # memory_space=pl.ANY + a per-block windowed make_async_copy instead of
        # keeping the whole table VMEM-resident.
        raise ValueError("embedding table too large to keep VMEM-resident")

    kernel = functools.partial(_rel_pos_kernel, max_len=max_len, seq_len=seq_len,
                               pad_front=pad_front, aligned=aligned)
    out = pl.pallas_call(
        kernel,
        out_shape=jax.ShapeDtypeStruct((seq_len, seq_len, d_model), table.dtype),
        grid=(n_i, n_j),
        # Whole padded table stays VMEM-resident across grid steps (constant
        # block index => no per-step re-DMA).
        in_specs=[pl.BlockSpec((rows_total, d_model), lambda i, j: (0, 0))],
        # Trailing dim is the full d_model => no (8,128) constraint on it; when
        # d_model % 128 == 0 every per-row store is a full unmasked vreg store.
        # TODO(synk): fully lane+sublane-dense stores for d_model < 128 require
        # packing >=8 output rows across sublanes (XLU relayout) before storing.
        out_specs=pl.BlockSpec((block_i, block_j, d_model),
                               lambda i, j: (i, j, 0)),
        scratch_shapes=[pltpu.VMEM((block_i + block_j - 1, d_model), table.dtype)],
        compiler_params=pltpu.CompilerParams(
            dimension_semantics=("parallel", "parallel"),
            vmem_limit_bytes=int(vmem_limit)),
    )(tbl)
    return out


if __name__ == "__main__":
    max_len = 16
    d_model = 32
    batch = 2
    seq_len = 8

    key = jax.random.PRNGKey(0)
    k_tab, k_x = jax.random.split(key)

    # Deterministic "nn.Embedding" weight init (N(0,1), like PyTorch default).
    table = jax.random.normal(k_tab, (2 * max_len - 1, d_model), dtype=jnp.float32)
    # Token ids are irrelevant to the forward; only the shape matters.
    x = jax.random.randint(k_x, (batch, seq_len), 0, 100, dtype=jnp.int32)

    out = relative_positional_embedding(x, table, max_len)
    out = jax.block_until_ready(out)

    # Pure-JAX reference.
    pos = jnp.arange(seq_len)
    rel = pos[None, :] - pos[:, None] + (max_len - 1)
    ref = table[rel]  # (seq_len, seq_len, d_model)

    assert out.shape == (seq_len, seq_len, d_model)
    assert bool(jnp.array_equal(out, ref)), "mismatch vs reference"
    print("KERNEL_OK")
</pallas_src>

<mosaic_0001>
module attributes {stable_mosaic.version = 11 : i64} {
  func.func @_rel_pos_kernel(%arg0: i32, %arg1: i32, %arg2: memref<32x32xf32, #tpu.memory_space<vmem>>, %arg3: memref<2x8x32xf32, #tpu.memory_space<vmem>>, %arg4: memref<9x32xf32, #tpu.memory_space<vmem>>) attributes {dimension_semantics = [#tpu.dimension_semantics<parallel>, #tpu.dimension_semantics<parallel>], iteration_bounds = array<i64: 4, 1>, scalar_prefetch = 0 : i64, scratch_operands = 1 : i64, tpu.core_type = #tpu.core_type<tc>, window_params = [{pipeline_mode = #tpu.pipeline_mode<synchronous>, transform_indices = @transform_0, window_bounds = array<i64: 32, 32>}, {transform_indices = @transform_1, window_bounds = array<i64: 2, 8, 32>}]} {
    %c2_i32 = arith.constant 2 : i32
    %0 = arith.muli %arg0, %c2_i32 : i32
    %c8_i32 = arith.constant 8 : i32
    %1 = arith.muli %arg1, %c8_i32 : i32
    %c15_i32 = arith.constant 15 : i32
    %2 = arith.subi %c15_i32, %0 : i32
    %3 = arith.addi %2, %1 : i32
    %4 = arith.index_cast %3 : i32 to index
    %c0 = arith.constant 0 : index
    %5 = vector.load %arg2[%4, %c0] : memref<32x32xf32, #tpu.memory_space<vmem>>, vector<9x32xf32>
    %c0_0 = arith.constant 0 : index
    %c0_1 = arith.constant 0 : index
    %6 = vector.load %arg4[%c0_0, %c0_1] : memref<9x32xf32, #tpu.memory_space<vmem>>, vector<9x32xf32>
    tpu.vector_store %arg4[%c0_0, %c0_1], %5 {strides = array<i32>} : memref<9x32xf32, #tpu.memory_space<vmem>>, vector<9x32xf32>,
    %c1 = arith.constant 1 : index
    %c0_2 = arith.constant 0 : index
    %7 = vector.load %arg4[%c1, %c0_2] : memref<9x32xf32, #tpu.memory_space<vmem>>, vector<8x32xf32>
    %c0_3 = arith.constant 0 : index
    %c0_4 = arith.constant 0 : index
    %c0_5 = arith.constant 0 : index
    %8 = vector.load %arg3[%c0_3, %c0_4, %c0_5] : memref<2x8x32xf32, #tpu.memory_space<vmem>>, vector<1x8x32xf32>
    %9 = vector.shape_cast %8 : vector<1x8x32xf32> to vector<8x32xf32>
    %10 = vector.shape_cast %7 : vector<8x32xf32> to vector<1x8x32xf32>
    tpu.vector_store %arg3[%c0_3, %c0_4, %c0_5], %10 {strides = array<i32>} : memref<2x8x32xf32, #tpu.memory_space<vmem>>, vector<1x8x32xf32>,
    %c0_6 = arith.constant 0 : index
    %c0_7 = arith.constant 0 : index
    %11 = vector.load %arg4[%c0_6, %c0_7] : memref<9x32xf32, #tpu.memory_space<vmem>>, vector<8x32xf32>
    %c1_8 = arith.constant 1 : index
    %c0_9 = arith.constant 0 : index
    %c0_10 = arith.constant 0 : index
    %12 = vector.load %arg3[%c1_8, %c0_9, %c0_10] : memref<2x8x32xf32, #tpu.memory_space<vmem>>, vector<1x8x32xf32>
    %13 = vector.shape_cast %12 : vector<1x8x32xf32> to vector<8x32xf32>
    %14 = vector.shape_cast %11 : vector<8x32xf32> to vector<1x8x32xf32>
    tpu.vector_store %arg3[%c1_8, %c0_9, %c0_10], %14 {strides = array<i32>} : memref<2x8x32xf32, #tpu.memory_space<vmem>>, vector<1x8x32xf32>,
    return
  }
  func.func @transform_0(%arg0: i32, %arg1: i32) -> (i32, i32) {
    %c0_i32 = arith.constant 0 : i32
    %c0_i32_0 = arith.constant 0 : i32
    %c0_i32_1 = arith.constant 0 : i32
    return %c0_i32, %c0_i32_0 : i32, i32
  }
  func.func @transform_1(%arg0: i32, %arg1: i32) -> (i32, i32, i32) {
    %c0_i32 = arith.constant 0 : i32
    %c0_i32_0 = arith.constant 0 : i32
    return %arg0, %arg1, %c0_i32 : i32, i32, i32
  }
}

</mosaic_0001>

<bundles_post_ra>
// kernel: tpu_custom_call.1
= control target key start
LH: loop header
LB: loop body
LE: loop exit
PB: predicated region body
PF: predicated region fallthrough
CT: control target
= control target key end

     0   :  { %6 = vsyncpa [#allocation4], 0  ;;  %s548_s0 = inlined_call_operand.hbm [shape: f32[32,32], index: 0, kind: input, shape index: {}]   ;;  %s549_s1 = inlined_call_operand.hbm [shape: f32[8,8,32], index: 1, kind: output, shape index: {}]  }
   0x1   :  { %7 = vsyncpa [#allocation5], 0 }
   0x2   :  { %9 = vsyncpa [#allocation5 + $0x1], 0  ;;  %s449_s6 = smov 0   ;;  %s451_s7 = smov 0  }
   0x3   :  { %s453_s8 = smov 0   ;;  %s455_s9 = smov 0  }
   0x4   :  { %s457_s10 = smov 0   ;;  %s459_s11 = smov 0  }
   0x5 LB: > { %s235_s12 = sadd.s32 4294967295, %s432_s11   ;;  %s236_s13 = sadd.s32 4294967294, %s432_s11   ;;  %s432_s11 = sphi %s459_s11, %s15_s11   ;;  %s428_s10 = sphi %s457_s10, %s556_s10   ;;  %s424_s9 = sphi %s455_s9, %s555_s9   ;;  %s420_s8 = sphi %s453_s8, %s554_s8   ;;  %s416_s7 = sphi %s451_s7, %s553_s7   ;;  %s412_s6 = sphi %s449_s6, %s552_s6  }
   0x6   : > { %s27_s14 = sadd.s32 1, %s428_s10  ;;  %s57_s15 = sadd.s32 1, %s420_s8 }
   0x7   : > { %p29_p0 = scmp.ge.s32.totalorder %s27_s14, 4  ;;  %p67_p1 = scmp.ne.s32.totalorder %s420_s8, %s416_s7 }
   0x8   : > { %p68_p2 = scmp.eq.s32.totalorder %s235_s12, 3  ;;  %p73_p3 = scmp.ne.s32.totalorder %s416_s7, %s412_s6 }
   0x9   : > { %s558_s14 = smov (%p29_p0, %s27_s14), 0  ;;  %p74_p5 = scmp.eq.s32.totalorder %s236_s13, 3 }
   0xa   : > { %p489_p4 = por %p68_p2, %p67_p1  ;;  %s52_s17 = ssub.s32 %s428_s10, %s558_s14 }
   0xb   : > { %p237_p6 = scmp.ge.s32.totalorder %s432_s11, 1  ;;  %p55_p7 = scmp.eq.s32.totalorder %s52_s17, 0 }
   0xc   : > { %p496_p8 = por %p74_p5, %p73_p3  ;;  %p81_p9 = scmp.lt.s32.totalorder %s432_s11, 5 }
   0xd   : > { %s502_s19 = scalar_select %p55_p7, %s420_s8, %s57_s15  }
   0xe   : > { %p82_p10 = pnand %p237_p6, %p81_p9  ;;  %p264_p11 = scmp.eq.s32.totalorder %s235_s12, 0 }
   0xf   : > { %s92_s22 = sshll.u32 %s548_s0, 4  ;;  %s434_s23 = smov [#allocation3]   ;;  %s93_s22 = int_to_ptr.hbm [resolvable:$true] %s92_s22 }
  0x10   : > { %p256_p12 = pneg %p82_p10  ;;  %s94_s24 = sshll.u32 %s434_s23, 4  ;;  %s95_s24 = int_to_ptr.vmem [resolvable:$true] %s94_s24 }
  0x11   : > { %s435_s25 = smov 128   ;;  %s436_s26 = smov 8  }
  0x12   : > { %p257_p13 = pnand %p264_p11, %p256_p12  ;;  %110 = sbr.rel (%p82_p10) target bundleno = 42 (0x2a), region = 24 }
  0x14   : > { %259 = dma.hbm_to_vmem [thread:$0]  (!%p257_p13), %s93_s22, 512, %s95_s24, [#allocation4], %s435_s25, %s435_s25, %s436_s26  }
  0x17   : > { %403 = dma.done.wait (%p264_p11), [#allocation4], 512  }
  0x18   : > { %405 = vsyncadd (%p264_p11), [#allocation4], 4294966784  ;;  %s242_s27 = sshll.u32 %s424_s9, 1  ;;  %s123_s29 = sand.u32 1, %s416_s7   ;;  %vm134_vm0 = vcmask 261120   ;;  %vm136_vm1 = vcmask 253952  }
  0x19   : > { %s129_s28 = ssub.s32 15, %s242_s27  ;;  %s241_s30 = sshll.u32 %s123_s29, 4 }
  0x1a   : > { %s249_s2 = sshll.u32 %s424_s9, 4  ;;  %s131_s3 = scalar_lea.vmem [#allocation3], %s129_s28 }
  0x1b   : > { %v132_v0 = vld [vmem:[%s131_s3] sm:$0xff]  ;;  %v133_v1 = vld [vmem:[%s131_s3 + $0x8] sm:$0x1]  ;;  %s156_s12 = scalar_lea.hbm %s549_s1, %s249_s2  ;;  %s125_s13 = scalar_lea.vmem [#allocation6], %s241_s30 }
  0x1c   : > { %135 = vst.msk [vmem:[#allocation2] sm:$0xff] %vm134_vm0, %v132_v0  ;;  %s157_s15 = sshll.u32 %s125_s13, 4  ;;  %s159_s17 = sshll.u32 %s156_s12, 4  ;;  %s158_s15 = int_to_ptr.vmem [resolvable:$true] %s157_s15  ;;  %s160_s17 = int_to_ptr.hbm [resolvable:$true] %s159_s17 }
  0x1d   : > { %137 = vst.msk [vmem:[#allocation2 + $0x8] sm:$0x1] %vm136_vm1, %v133_v1  ;;  %s144_s9 = scalar_lea.sflag [#allocation5], %s123_s29  ;;  %s364_s20 = sshra.s32 %s160_s17, 4  ;;  %s365_s20 = int_to_ptr.hbm [resolvable:$true] %s364_s20 }
  0x1e   : > { %s366_s21 = scalar_lea.hbm %s365_s20, 16  ;;  %s370_s24 = scalar_lea.hbm %s549_s1, 64 }
  0x1f   : > { %p367_p0 = scmp.ne.s32.totalorder %s365_s20, %s366_s21  ;;  %p371_p3 = scmp.lt.s32.totalorder %s365_s20, %s549_s1 }
  0x20   : > { %p372_p5 = scmp.lt.s32.totalorder %s370_s24, %s366_s21 }
  0x21   : > { %p368_p1 = pnand %p367_p0, %p489_p4 }
  0x22   : > { %p373_p6 = por %p372_p5, %p371_p3 }
  0x23   : > { %v140_v2 = vld [vmem:[#allocation2] sm:$0xff]  ;;  %p369_p2 = pneg %p368_p1 }
  0x24   : > { %v138_v3 = vld [vmem:[#allocation2 + $0x1] sm:$0xff]  ;;  %243 = vst.msk [vmem:[%s125_s13 + $0x8] sm:$0xff] %vm134_vm0, %v140_v2 }
  0x25   : > { %139 = vst.msk [vmem:[%s125_s13] sm:$0xff] %vm134_vm0, %v138_v3  ;;  %p374_p7 = pnand %p373_p6, %p369_p2 }
  0x27   : > { %377 = shalt.err (!%p374_p7)
}
  0x28   : > { %s437_s27 = smov 128   ;;  %s438_s28 = smov 8  }
  0x29   : > { %254 = dma.vmem_to_hbm [thread:$0]  (%p489_p4), %s158_s15, 256, %s160_s17, %s144_s9, %s437_s27, %s437_s27, %s438_s28  }
  0x2a PF: > { %p266_p9 = scmp.ge.s32.totalorder %s432_s11, 2  ;;  %s174_s29 = sand.u32 1, %s412_s6  }
  0x2b   : > { %s175_s30 = scalar_lea.sflag [#allocation5], %s174_s29 }
  0x2c   : > { %p261_p10 = pnand %p266_p9, %p496_p8 }
  0x2e   : > { %p262_p11 = pneg %p261_p10 }
  0x30   : > { %407 = dma.done.wait (%p262_p11), %s175_s30, 256  }
  0x31   : > { %409 = vsyncadd (%p262_p11), %s175_s30, 4294967040  ;;  %s15_s11 = sadd.s32 1, %s432_s11   ;;  %s552_s6 = smov %s416_s7 }
  0x32   : > { %p12_p12 = scmp.ge.s32.totalorder %s15_s11, 6   ;;  %s553_s7 = smov %s420_s8 }
  0x33   : > { %s554_s8 = smov %s502_s19  ;;  %s555_s9 = smov %s428_s10 }
  0x34   : > { %s556_s10 = smov %s558_s14  ;;  %14 = sbr.rel (!%p12_p12) target bundleno = 5 (0x5), region = 63 }
  0x39   :  { %181 = vsyncpa [#allocation4], 1 }
  0x3a   :  { %183 = vsyncpa [#allocation4 + $0x1], 1 }
  0x3b   :  { %184 = vsyncpa [#allocation5], 1 }
  0x3c   :  { %186 = vsyncpa [#allocation5 + $0x1], 1 }

</bundles_post_ra>
